<compile_context>
chip_gen: v7x
topology: tpu7x:2x2x1
jax: 0.10.0
libtpu: 0.0.40
codegen_flags: <defaults>
</compile_context>

<pallas_src>
import functools

import jax
import jax.numpy as jnp
from jax import lax
from jax.experimental import pallas as pl
from jax.experimental.pallas import tpu as pltpu

GAMMA = 1.5   # modulating factor uses d*sqrt(d) == d**1.5 (exact for gamma=1.5)
ALPHA = 0.25
LANE = 128
SUBLANE = 8
CHUNK_ROWS = 256                    # 256*128*4B = 128 KiB f32 per intermediate
MAX_BLOCK_BYTES = 2 * 1024 * 1024   # ~2 MiB per input block (x2 inputs x2 buffers = 8 MiB)
ROW_ALIGN = 32                      # keeps bf16/int8 sublane packing legal when block != full dim
SPLIT_ROWS = 2048                   # above this, force >=2 grid steps (v7x dual-TC)


def _round_up(x, m):
    return -(-x // m) * m


def _round_down(x, m):
    return (x // m) * m


def _elementwise_qfocal(x, t):
    """Per-element quality focal loss, f32 in / f32 out (kernel version)."""
    # Shared transcendental: e = exp(-|x|), reused for BCE log-term and sigmoid.
    e = jnp.exp(-jnp.abs(x))
    # Numerically stable BCEWithLogitsLoss: max(x,0) - x*t + log1p(exp(-|x|))
    bce = jnp.maximum(x, 0.0) - x * t + jnp.log1p(e)
    # sigmoid(x): x>=0 -> 1/(1+e) ; x<0 -> e/(1+e).  Approx reciprocal goes to
    # the EUP slot (v7x is compute-bound here; ~1e-3..1e-4 rel error).
    pred_prob = jnp.where(x >= 0.0, 1.0, e) * pl.reciprocal(1.0 + e, approx=True)
    # alpha_factor = t*ALPHA + (1-t)*(1-ALPHA), as a single multiply-add.
    alpha_factor = (1.0 - ALPHA) + t * (2.0 * ALPHA - 1.0)
    d = jnp.abs(t - pred_prob)
    # TODO(synk): d*sqrt(d) hardcodes gamma=1.5; use d**gamma if made configurable.
    modulating_factor = d * jnp.sqrt(d)
    return bce * alpha_factor * modulating_factor


def _elementwise_qfocal_jnp(x, t):
    """Plain-JAX per-element loss (tail path + reference)."""
    e = jnp.exp(-jnp.abs(x))
    bce = jnp.maximum(x, 0.0) - x * t + jnp.log1p(e)
    pred_prob = jax.nn.sigmoid(x)
    alpha_factor = t * ALPHA + (1.0 - t) * (1.0 - ALPHA)
    modulating_factor = jnp.abs(t - pred_prob) ** GAMMA
    return bce * alpha_factor * modulating_factor


def _qfocal_kernel(pred_ref, true_ref, out_ref, *, row_tile, total_rows):
    """One grid step: reduce a (row_tile, 128) tile to an (8, 128) partial sum."""
    needs_mask = (total_rows % row_tile) != 0          # static
    base_row = pl.program_id(0) * row_tile

    def accum(r0, csize, acc):
        x = pred_ref[pl.ds(r0, csize), :].astype(jnp.float32)
        t = true_ref[pl.ds(r0, csize), :].astype(jnp.float32)
        loss = _elementwise_qfocal(x, t)
        if needs_mask:
            # Mask rows past the end of the array (partial last grid block).
            row_idx = base_row + r0 + lax.broadcasted_iota(jnp.int32, (csize, LANE), 0)
            loss = jnp.where(row_idx < total_rows, loss, 0.0)
        # VPU-only partial reduce: fold sublane groups of 8 into one vreg slab.
        return acc + jnp.sum(loss.reshape(csize // SUBLANE, SUBLANE, LANE), axis=0)

    acc = jnp.zeros((SUBLANE, LANE), jnp.float32)
    chunk = min(CHUNK_ROWS, row_tile)
    n_full = row_tile // chunk
    rem = row_tile - n_full * chunk                    # multiple of 8 by construction

    if n_full == 1:
        acc = accum(0, chunk, acc)
    else:
        acc = lax.fori_loop(
            0, n_full,
            lambda g, a: accum(pl.multiple_of(g * chunk, chunk), chunk, a),
            acc, unroll=2)
    if rem:
        acc = accum(n_full * chunk, rem, acc)

    out_ref[0] = acc


def _choose_row_tile(rows, itemsize):
    """Row tile: ~MAX_BLOCK_BYTES per input block, >=2 grid steps for big inputs."""
    max_tile = _round_down(MAX_BLOCK_BYTES // (LANE * itemsize), ROW_ALIGN)
    if rows >= 2 * max_tile:
        return max_tile                                   # many steps naturally
    if rows > SPLIT_ROWS:
        return min(max_tile, _round_up(-(-rows // 2), ROW_ALIGN))   # >=2 steps (v7x)
    if rows >= ROW_ALIGN:
        return _round_down(rows, ROW_ALIGN)               # 1-2 steps, tail masked
    return _round_down(rows, SUBLANE)                     # small input


def qfocal_loss(pred, true):
    """Quality focal loss, mean reduction (matches QFocalLoss(nn.BCEWithLogitsLoss()))."""
    assert pred.shape == true.shape
    n_elem = pred.size
    assert n_elem > 0

    flat_p = jnp.ravel(pred)
    flat_t = jnp.ravel(true)

    rows = n_elem // LANE
    main_len = rows * LANE
    tail = n_elem - main_len

    loss_sum = jnp.float32(0.0)

    if rows >= SUBLANE:
        itemsize = max(jnp.dtype(pred.dtype).itemsize, jnp.dtype(true.dtype).itemsize)
        row_tile = _choose_row_tile(rows, itemsize)
        n_grid = -(-rows // row_tile)

        # Reshape of a contiguous buffer is free; only slice when a tail exists.
        p_main = flat_p if tail == 0 else lax.slice(flat_p, (0,), (main_len,))
        t_main = flat_t if tail == 0 else lax.slice(flat_t, (0,), (main_len,))
        pred2d = p_main.reshape(rows, LANE)   # keep native dtype on the wire
        true2d = t_main.reshape(rows, LANE)

        kernel = functools.partial(_qfocal_kernel, row_tile=row_tile, total_rows=rows)
        partials = pl.pallas_call(
            kernel,
            out_shape=jax.ShapeDtypeStruct((n_grid, SUBLANE, LANE), jnp.float32),
            grid_spec=pltpu.PrefetchScalarGridSpec(
                num_scalar_prefetch=0,
                grid=(n_grid,),
                in_specs=[
                    pl.BlockSpec((row_tile, LANE), lambda i: (i, 0)),
                    pl.BlockSpec((row_tile, LANE), lambda i: (i, 0)),
                ],
                out_specs=pl.BlockSpec((1, SUBLANE, LANE), lambda i: (i, 0, 0)),
            ),
            compiler_params=pltpu.CompilerParams(
                dimension_semantics=("parallel",),
                vmem_limit_bytes=32 * 1024 * 1024,
            ),
        )(pred2d, true2d)
        loss_sum = loss_sum + jnp.sum(partials)
    else:
        # Tiny input: not worth a kernel launch; do everything in the tail path.
        main_len = 0
        tail = n_elem

    if tail:
        xt = lax.slice(flat_p, (main_len,), (n_elem,)).astype(jnp.float32)
        tt = lax.slice(flat_t, (main_len,), (n_elem,)).astype(jnp.float32)
        loss_sum = loss_sum + jnp.sum(_elementwise_qfocal_jnp(xt, tt))

    return (loss_sum / jnp.float32(n_elem)).astype(jnp.float32)


def _qfocal_ref(pred, true):
    """Pure-JAX reference for correctness checking."""
    x = pred.astype(jnp.float32)
    t = true.astype(jnp.float32)
    return jnp.mean(_elementwise_qfocal_jnp(x, t))


if __name__ == "__main__":
    key = jax.random.PRNGKey(0)
    k1, k2, k3, k4 = jax.random.split(key, 4)

    # Primary case: NCHW logits and targets, as produced upstream of this loss.
    pred = jax.random.normal(k1, (2, 4, 16, 16), dtype=jnp.float32)
    true = (jax.random.uniform(k2, (2, 4, 16, 16)) > 0.7).astype(jnp.float32)

    out = qfocal_loss(pred, true)
    jax.block_until_ready(out)
    ref = _qfocal_ref(pred, true)
    # rtol relaxed to cover pl.reciprocal(approx=True) (~1e-3..1e-4 rel error).
    assert jnp.allclose(out, ref, rtol=5e-3, atol=1e-6), (out, ref)

    # Secondary case: non-tile-aligned shape exercising the masked partial
    # last block and the <128-element plain-JAX tail (no jnp.pad anywhere).
    pred2 = jax.random.normal(k3, (3, 5, 7, 13), dtype=jnp.float32)
    true2 = (jax.random.uniform(k4, (3, 5, 7, 13)) > 0.7).astype(jnp.float32)
    out2 = qfocal_loss(pred2, true2)
    jax.block_until_ready(out2)
    ref2 = _qfocal_ref(pred2, true2)
    assert jnp.allclose(out2, ref2, rtol=5e-3, atol=1e-6), (out2, ref2)

    print("KERNEL_OK")
</pallas_src>

<mosaic_0001>
module attributes {stable_mosaic.version = 11 : i64} {
  func.func @_qfocal_kernel(%arg0: i32, %arg1: memref<16x128xf32, #tpu.memory_space<vmem>>, %arg2: memref<16x128xf32, #tpu.memory_space<vmem>>, %arg3: memref<1x8x128xf32, #tpu.memory_space<vmem>>) attributes {dimension_semantics = [#tpu.dimension_semantics<parallel>], iteration_bounds = array<i64: 1>, scalar_prefetch = 0 : i64, scratch_operands = 0 : i64, tpu.core_type = #tpu.core_type<tc>, window_params = [{transform_indices = @transform_0, window_bounds = array<i64: 16, 128>}, {transform_indices = @transform_1, window_bounds = array<i64: 16, 128>}, {transform_indices = @transform_2, window_bounds = array<i64: 1, 8, 128>}]} {
    %cst = arith.constant 0.000000e+00 : f32
    %0 = vector.broadcast %cst : f32 to vector<8x128xf32>
    %c0 = arith.constant 0 : index
    %c0_0 = arith.constant 0 : index
    %1 = vector.load %arg1[%c0, %c0_0] : memref<16x128xf32, #tpu.memory_space<vmem>>, vector<16x128xf32>
    %c0_1 = arith.constant 0 : index
    %c0_2 = arith.constant 0 : index
    %2 = vector.load %arg2[%c0_1, %c0_2] : memref<16x128xf32, #tpu.memory_space<vmem>>, vector<16x128xf32>
    %3 = math.absf %1 : vector<16x128xf32>
    %cst_3 = arith.constant 0.000000e+00 : f32
    %4 = vector.broadcast %cst_3 : f32 to vector<16x128xf32>
    %5 = arith.subf %4, %3 : vector<16x128xf32>
    %6 = math.exp %5 : vector<16x128xf32>
    %cst_4 = arith.constant 0.000000e+00 : f32
    %7 = vector.broadcast %cst_4 : f32 to vector<16x128xf32>
    %8 = arith.maximumf %1, %7 : vector<16x128xf32>
    %9 = arith.mulf %1, %2 : vector<16x128xf32>
    %10 = arith.subf %8, %9 : vector<16x128xf32>
    %11 = math.log1p %6 : vector<16x128xf32>
    %12 = arith.addf %10, %11 : vector<16x128xf32>
    %cst_5 = arith.constant 0.000000e+00 : f32
    %13 = vector.broadcast %cst_5 : f32 to vector<16x128xf32>
    %14 = arith.cmpf oge, %1, %13 : vector<16x128xf32>
    %cst_6 = arith.constant 1.000000e+00 : f32
    %15 = vector.broadcast %cst_6 : f32 to vector<16x128xf32>
    %16 = arith.select %14, %15, %6 : vector<16x128xi1>, vector<16x128xf32>
    %cst_7 = arith.constant 1.000000e+00 : f32
    %17 = vector.broadcast %cst_7 : f32 to vector<16x128xf32>
    %18 = arith.addf %17, %6 : vector<16x128xf32>
    %19 = tpu.reciprocal %18 {approx = true} : vector<16x128xf32> -> vector<16x128xf32>
    %20 = arith.mulf %16, %19 : vector<16x128xf32>
    %cst_8 = arith.constant -5.000000e-01 : f32
    %21 = vector.broadcast %cst_8 : f32 to vector<16x128xf32>
    %22 = arith.mulf %2, %21 : vector<16x128xf32>
    %cst_9 = arith.constant 7.500000e-01 : f32
    %23 = vector.broadcast %cst_9 : f32 to vector<16x128xf32>
    %24 = arith.addf %23, %22 : vector<16x128xf32>
    %25 = arith.subf %2, %20 : vector<16x128xf32>
    %26 = math.absf %25 : vector<16x128xf32>
    %27 = math.sqrt %26 : vector<16x128xf32>
    %28 = arith.mulf %26, %27 : vector<16x128xf32>
    %29 = arith.mulf %12, %24 : vector<16x128xf32>
    %30 = arith.mulf %29, %28 : vector<16x128xf32>
    %31 = vector.shape_cast %30 : vector<16x128xf32> to vector<2x8x128xf32>
    %cst_10 = arith.constant dense<0.000000e+00> : vector<8x128xf32>
    %32 = vector.multi_reduction <add>, %31, %cst_10 [0] : vector<2x8x128xf32> to vector<8x128xf32>
    %33 = arith.addf %0, %32 : vector<8x128xf32>
    %c0_11 = arith.constant 0 : index
    %c0_12 = arith.constant 0 : index
    %c0_13 = arith.constant 0 : index
    %34 = vector.load %arg3[%c0_11, %c0_12, %c0_13] : memref<1x8x128xf32, #tpu.memory_space<vmem>>, vector<1x8x128xf32>
    %35 = vector.shape_cast %34 : vector<1x8x128xf32> to vector<8x128xf32>
    %36 = vector.shape_cast %33 : vector<8x128xf32> to vector<1x8x128xf32>
    tpu.vector_store %arg3[%c0_11, %c0_12, %c0_13], %36 {strides = array<i32>} : memref<1x8x128xf32, #tpu.memory_space<vmem>>, vector<1x8x128xf32>,
    return
  }
  func.func @transform_0(%arg0: i32) -> (i32, i32) {
    %c0_i32 = arith.constant 0 : i32
    %c0_i32_0 = arith.constant 0 : i32
    return %arg0, %c0_i32 : i32, i32
  }
  func.func @transform_1(%arg0: i32) -> (i32, i32) {
    %c0_i32 = arith.constant 0 : i32
    %c0_i32_0 = arith.constant 0 : i32
    return %arg0, %c0_i32 : i32, i32
  }
  func.func @transform_2(%arg0: i32) -> (i32, i32, i32) {
    %c0_i32 = arith.constant 0 : i32
    %c0_i32_0 = arith.constant 0 : i32
    %c0_i32_1 = arith.constant 0 : i32
    return %arg0, %c0_i32, %c0_i32_0 : i32, i32, i32
  }
}

</mosaic_0001>

<bundles_post_ra>
// kernel: tpu_custom_call.1
= control target key start
LH: loop header
LB: loop body
LE: loop exit
PB: predicated region body
PF: predicated region fallthrough
CT: control target
= control target key end

     0   :  { %7 = vsyncpa [#allocation3], 0  ;;  %s284_s0 = inlined_call_operand.hbm [shape: f32[16,128], index: 0, kind: input, shape index: {}]   ;;  %s285_s1 = inlined_call_operand.hbm [shape: f32[16,128], index: 1, kind: input, shape index: {}]   ;;  %s286_s2 = inlined_call_operand.hbm [shape: f32[1,8,128], index: 2, kind: output, shape index: {}]  }
   0x1   :  { %8 = vsyncpa [#allocation6], 0 }
   0x2   :  { %9 = vsyncpa [#allocation4], 0  ;;  %s228_s9 = smov [#allocation2]   ;;  %s156_s13 = scalar_lea.hbm %s284_s0, 256 }
   0x3   :  { %s15_s10 = sshll.u32 %s228_s9, 4  ;;  %p157_p0 = scmp.ne.s32.totalorder %s284_s0, %s156_s13  ;;  %s16_s10 = int_to_ptr.vmem [resolvable:$true] %s15_s10 }
   0x4   :  { %p160_p1 = scmp.lt.u32.totalorder %s156_s13, %s284_s0 }
   0x6   :  { %p162_p2 = pnand %p160_p1, %p157_p0 }
   0x8   :  { %165 = shalt.err (!%p162_p2)
}
   0x9   :  { %s166_s18 = scalar_lea.vmem %s16_s10, 256  ;;  %p171_p4 = scmp.lt.s32.totalorder %s16_s10, %s16_s10 }
   0xa   :  { %p167_p3 = scmp.ne.s32.totalorder %s16_s10, %s166_s18  ;;  %p172_p5 = scmp.lt.s32.totalorder %s166_s18, %s166_s18 }
   0xc   :  { %p173_p6 = por %p172_p5, %p171_p4 }
   0xe   :  { %p174_p7 = pnand %p173_p6, %p167_p3 }
  0x10   :  { %177 = shalt.err (!%p174_p7)
}
  0x11   :  { %s229_s19 = smov 128   ;;  %s230_s20 = smov 8  }
  0x12   :  { %21 = dma.hbm_to_vmem [thread:$0]  %s284_s0, 256, %s16_s10, [#allocation3], %s229_s19, %s229_s19, %s230_s20  }
  0x13   :  { %s231_s23 = smov [#allocation5]   ;;  %s178_s27 = scalar_lea.hbm %s285_s1, 256 }
  0x14   :  { %s27_s24 = sshll.u32 %s231_s23, 4  ;;  %p179_p8 = scmp.ne.s32.totalorder %s285_s1, %s178_s27  ;;  %s28_s24 = int_to_ptr.vmem [resolvable:$true] %s27_s24 }
  0x15   :  { %p182_p9 = scmp.lt.u32.totalorder %s178_s27, %s285_s1 }
  0x17   :  { %p184_p10 = pnand %p182_p9, %p179_p8 }
  0x19   :  { %187 = shalt.err (!%p184_p10)
}
  0x1a   :  { %s188_s4 = scalar_lea.vmem %s28_s24, 256  ;;  %p193_p12 = scmp.lt.s32.totalorder %s28_s24, %s28_s24 }
  0x1b   :  { %p189_p11 = scmp.ne.s32.totalorder %s28_s24, %s188_s4  ;;  %p194_p13 = scmp.lt.s32.totalorder %s188_s4, %s188_s4 }
  0x1d   :  { %p195_p0 = por %p194_p13, %p193_p12 }
  0x1f   :  { %p196_p1 = pnand %p195_p0, %p189_p11 }
  0x21   :  { %199 = shalt.err (!%p196_p1)
}
  0x22   :  { %33 = dma.hbm_to_vmem [thread:$0]  %s285_s1, 256, %s28_s24, [#allocation6], %s229_s19, %s229_s19, %s230_s20  }
  0x23   :  { %222 = dma.done.wait [#allocation3], 256  }
  0x24   :  { %223 = vsyncadd [#allocation3], 4294967040 }
  0x25   :  { %224 = dma.done.wait [#allocation6], 256  }
  0x26   :  { %225 = vsyncadd [#allocation6], 4294967040  ;;  %v40_v0 = vld [vmem:[#allocation2] sm:$0xff]  ;;  %v41_v1 = vld [vmem:[#allocation2 + $0x8] sm:$0xff]  ;;  %s232_s1 = smov [#allocation7]  }
  0x27   :  { %v44_v2 = vand.u32 2147483647, %v40_v0  ;;  %v45_v3 = vand.u32 2147483647, %v41_v1  ;;  %vm78_vm0 = vcmp.ge.f32.partialorder %v40_v0, 0.0  ;;  %vm79_vm1 = vcmp.ge.f32.partialorder %v41_v1, 0.0 }
  0x28   :  { %v42_v15 = vld [vmem:[#allocation5] sm:$0xff]  ;;  %v43_v17 = vld [vmem:[#allocation5 + $0x8] sm:$0xff]  ;;  %v52_v32 = vmax.f32 %v40_v0, 0.0  ;;  %v53_v34 = vmax.f32 %v41_v1, 0.0  ;;  %s125_s6 = sshll.u32 %s232_s1, 4  ;;  %s126_s6 = int_to_ptr.vmem [resolvable:$true] %s125_s6 }
  0x29   :  { %v46_v4 = vsub.f32 0.0, %v44_v2  ;;  %v47_v5 = vsub.f32 0.0, %v45_v3  ;;  %v54_v33 = vmul.f32 %v42_v15, %v40_v0  ;;  %v55_v35 = vmul.f32 %v43_v17, %v41_v1  ;;  %s200_s7 = scalar_lea.vmem %s126_s6, 128  ;;  %p205_p3 = scmp.lt.s32.totalorder %s126_s6, %s126_s6 }
  0x2a   :  { %v88_v41 = vmul.f32 -0.5, %v42_v15  ;;  %v89_v44 = vmul.f32 -0.5, %v43_v17  ;;  %p201_p2 = scmp.ne.s32.totalorder %s126_s6, %s200_s7  ;;  %p206_p4 = scmp.lt.s32.totalorder %s200_s7, %s200_s7 }
  0x2b   :  { %v48_v6 = vmul.f32 1.442695, %v46_v4  ;;  %v50_v7 = vmul.f32 1.442695, %v47_v5  ;;  %v56_v40 = vsub.f32 %v52_v32, %v54_v33  ;;  %v57_v42 = vsub.f32 %v53_v34, %v55_v35 }
  0x2c   :  { %v90_v47 = vadd.f32 0.75, %v88_v41  ;;  %v91_v50 = vadd.f32 0.75, %v89_v44  ;;  %p207_p5 = por %p206_p4, %p205_p3 }
  0x2d   :  { %140 = vpow2.f32 %v48_v6 }
  0x2e   :  { %142 = vpow2.f32 %v50_v7  ;;  %p208_p6 = pnand %p207_p5, %p201_p2 }
  0x37   :  { %v141_v8 = vpop.eup %140 }
  0x38   :  { %v143_v9 = vpop.eup %142  ;;  %v58_v10 = vadd.f32 1.0, %v141_v8  ;;  %v80_v12 = vsel %vm78_vm0, 1.0, %v141_v8  ;;  %v61_v18 = vmul.f32 -0.5, %v141_v8  ;;  %v64_v27 = vand.u32 2147483647, %v141_v8 }
  0x39   :  { %v67_v11 = vadd.f32 1.0, %v143_v9  ;;  %v81_v13 = vsel %vm79_vm1, 1.0, %v143_v9  ;;  %v70_v20 = vmul.f32 -0.5, %v143_v9  ;;  %v73_v31 = vand.u32 2147483647, %v143_v9 }
  0x3a   :  { %144 = vrcp.f32 %v58_v10  ;;  %v62_v24 = vadd.f32 1.0, %v61_v18  ;;  %vm65_vm2 = vcmp.lt.f32.partialorder %v64_v27, 0.0004427343 }
  0x3b   :  { %146 = vrcp.f32 %v67_v11  ;;  %v71_v28 = vadd.f32 1.0, %v70_v20  ;;  %vm74_vm3 = vcmp.lt.f32.partialorder %v73_v31, 0.0004427343 }
  0x3c   :  { %148 = vlog2.f32 %v58_v10  ;;  %v63_v37 = vmul.f32 %v141_v8, %v62_v24 }
  0x3d   :  { %150 = vlog2.f32 %v67_v11  ;;  %v72_v39 = vmul.f32 %v143_v9, %v71_v28 }
  0x44   :  { %v145_v14 = vpop.eup %144 }
  0x45   :  { %v147_v16 = vpop.eup %146  ;;  %v86_v19 = vmul.f32 %v145_v14, %v80_v12 }
  0x46   :  { %v87_v21 = vmul.f32 %v147_v16, %v81_v13  ;;  %v149_v26 = vpop.eup %148 }
  0x47   :  { %v92_v22 = vsub.f32 %v42_v15, %v86_v19  ;;  %v151_v30 = vpop.eup %150  ;;  %v60_v36 = vmul.f32 0.6931472, %v149_v26 }
  0x48   :  { %v93_v23 = vsub.f32 %v43_v17, %v87_v21  ;;  %v69_v38 = vmul.f32 0.6931472, %v151_v30 }
  0x49   :  { %v94_v25 = vand.u32 2147483647, %v92_v22  ;;  %v66_v43 = vsel %vm65_vm2, %v63_v37, %v60_v36 }
  0x4a   :  { %v95_v29 = vand.u32 2147483647, %v93_v23  ;;  %v75_v45 = vsel %vm74_vm3, %v72_v39, %v69_v38  ;;  %v76_v46 = vadd.f32 %v66_v43, %v56_v40 }
  0x4b   :  { %152 = vrsqrt.f32 %v94_v25  ;;  %v77_v49 = vadd.f32 %v75_v45, %v57_v42  ;;  %vm98_vm4 = vcmp.eq.f32.partialorder %v94_v25, inf  ;;  %v101_v51 = vand.u32 2147483648, %v94_v25 }
  0x4c   :  { %154 = vrsqrt.f32 %v95_v29  ;;  %vm100_vm5 = vcmp.eq.f32.partialorder %v94_v25, 0.0  ;;  %vm105_vm6 = vcmp.eq.f32.partialorder %v95_v29, inf  ;;  %v108_v54 = vand.u32 2147483648, %v95_v29 }
  0x4d   :  { %vm107_vm7 = vcmp.eq.f32.partialorder %v95_v29, 0.0  ;;  %v112_v57 = vmul.f32 %v90_v47, %v76_v46  ;;  %v113_v60 = vmul.f32 %v91_v50, %v77_v49 }
  0x55   :  { %v153_v48 = vpop.eup %152 }
  0x56   :  { %v155_v52 = vpop.eup %154  ;;  %v97_v53 = vmul.f32 %v153_v48, %v94_v25 }
  0x57   :  { %v104_v55 = vmul.f32 %v155_v52, %v95_v29 }
  0x58   :  { %v99_v56 = vsel %vm98_vm4, %v94_v25, %v97_v53 }
  0x59   :  { %v102_v58 = vsel %vm100_vm5, %v101_v51, %v99_v56  ;;  %v106_v59 = vsel %vm105_vm6, %v95_v29, %v104_v55 }
  0x5a   :  { %v109_v61 = vsel %vm107_vm7, %v108_v54, %v106_v59  ;;  %v110_v62 = vmul.f32 %v102_v58, %v94_v25 }
  0x5b   :  { %v111_v63 = vmul.f32 %v109_v61, %v95_v29 }
  0x5c   :  { %v114_v0 = vmul.f32 %v112_v57, %v110_v62 }
  0x5d   :  { %v115_v1 = vmul.f32 %v113_v60, %v111_v63 }
  0x5f   :  { %v116_v2 = vadd.f32 %v115_v1, %v114_v0 }
  0x61   :  { %118 = vst [vmem:[#allocation7] sm:$0xff] %v116_v2 }
  0x62   :  { %211 = shalt.err (!%p208_p6)
}
  0x63   :  { %s212_s10 = scalar_lea.hbm %s286_s2, 128 }
  0x64   :  { %p213_p7 = scmp.ne.s32.totalorder %s286_s2, %s212_s10  ;;  %p216_p8 = scmp.lt.u32.totalorder %s212_s10, %s286_s2 }
  0x66   :  { %p218_p9 = pnand %p216_p8, %p213_p7 }
  0x68   :  { %221 = shalt.err (!%p218_p9)
}
  0x69   :  { %128 = dma.vmem_to_hbm [thread:$0]  %s126_s6, 128, %s286_s2, [#allocation4]  }
  0x6a   :  { %226 = dma.done.wait [#allocation4], 128  }
  0x6b   :  { %227 = vsyncadd [#allocation4], 4294967168 }
  0x6c   :  { %132 = vsyncpa [#allocation3], 1 }
  0x6d   :  { %133 = vsyncpa [#allocation6], 1 }
  0x6e   :  { %134 = vsyncpa [#allocation4], 1 }

</bundles_post_ra>
